<compile_context>
chip_gen: v7x
topology: tpu7x:2x2x1
jax: 0.10.0
libtpu: 0.0.40
codegen_flags: <defaults>
</compile_context>

<pallas_src>
import numpy as np
import jax
import jax.numpy as jnp
from jax.experimental import pallas as pl
from jax.experimental.pallas import tpu as pltpu

# ----------------------------- config (mirrors a typical AnchorHeadSingle cfg)
NUM_CLASS = 3
NUM_ANCHORS_PER_LOC = NUM_CLASS * 2          # 2 rotations per class
NUM_DIR_BINS = 2
DIR_OFFSET = 0.78539                          # ~pi/4 (matches OpenPCDet cfgs)
DIR_LIMIT_OFFSET = 0.0
CODE_SIZE = 7                                 # ResidualCoder
ROTATIONS = (0.0, float(np.pi) / 2.0)
ANCHOR_SIZES = ((3.9, 1.6, 1.56), (0.8, 0.6, 1.73), (1.76, 0.6, 1.73))
ANCHOR_BOTTOMS = (-1.78, -0.6, -0.6)
POINT_CLOUD_RANGE = (0.0, -8.0, -3.0, 16.0, 8.0, 1.0)

# fused input layout (sublane rows)
DIR_ROW = 8                                   # dir logits live at rows 8..8+bins-1
C_IN = 16                                     # 7 box + pad + 2 dir + pad  (mult of 8)
C_ANC = 8                                     # 7 anchor params + precomputed diagonal
C_OUT = 8                                     # 7 decoded params + 1 pad row

TA_CAP = 32768                                # max lanes per tile (8 MiB dbl-buffered)

PERIOD = 2.0 * np.pi / NUM_DIR_BINS
INV_PERIOD = 1.0 / PERIOD


def _round_up(x, m):
    return ((x + m - 1) // m) * m


# ----------------------------------------------------------------- anchors
def generate_anchors(feat_h, feat_w):
    """Deterministic mimic of AnchorGenerator: per-class anchors of shape
    (H, W, num_class, num_rot, 7), concatenated along the class axis
    (the torch.cat(..., dim=-3) in the module), then flattened to (NA, 7)."""
    x0, y0, _, x1, y1, _ = POINT_CLOUD_RANGE
    xs = np.linspace(x0, x1, feat_w, dtype=np.float32)
    ys = np.linspace(y0, y1, feat_h, dtype=np.float32)
    per_class = []
    for ci in range(NUM_CLASS):
        dx, dy, dz = ANCHOR_SIZES[ci]
        zc = ANCHOR_BOTTOMS[ci] + dz / 2.0
        a = np.zeros((feat_h, feat_w, 1, len(ROTATIONS), CODE_SIZE), np.float32)
        a[..., 0] = xs[None, :, None, None]
        a[..., 1] = ys[:, None, None, None]
        a[..., 2] = zc
        a[..., 3] = dx
        a[..., 4] = dy
        a[..., 5] = dz
        a[..., 6] = np.asarray(ROTATIONS, np.float32)[None, None, None, :]
        per_class.append(a)
    anchors = np.concatenate(per_class, axis=-3)          # (H, W, C, R, 7)
    return jnp.asarray(anchors.reshape(-1, CODE_SIZE))     # (NA, 7)


# ----------------------------------------------------------------- kernel
def _decode_kernel(pred_ref, anc_ref, out_ref):
    # pred_ref: (1, C_IN, TA)   rows 0..6 = box encoding, rows 8..9 = dir logits
    # anc_ref : (C_ANC, TA)     rows 0..6 = anchor params, row 7 = diagonal
    # out_ref : (1, C_OUT, TA)  rows 0..6 = decoded box, row 7 = pad
    pred = pred_ref[0]
    anc = anc_ref[...]

    xa, ya, za = anc[0:1], anc[1:2], anc[2:3]
    dxa, dya, dza = anc[3:4], anc[4:5], anc[5:6]
    ra = anc[6:7]
    diag = anc[7:8]                               # precomputed sqrt(dxa^2+dya^2)

    xt, yt, zt = pred[0:1], pred[1:2], pred[2:3]
    dxt, dyt, dzt = pred[3:4], pred[4:5], pred[5:6]
    rt = pred[6:7]

    # ResidualCoder.decode_torch — direct per-row stores (no concat relayout)
    out_ref[0, 0:1, :] = xt * diag + xa
    out_ref[0, 1:2, :] = yt * diag + ya
    out_ref[0, 2:3, :] = zt * dza + za
    out_ref[0, 3:4, :] = jnp.exp(dxt) * dxa
    out_ref[0, 4:5, :] = jnp.exp(dyt) * dya
    out_ref[0, 5:6, :] = jnp.exp(dzt) * dza

    rg = rt + ra

    # direction-bin argmax (strict '>' update => first-occurrence tie-break,
    # same as torch.max)
    best = pred[DIR_ROW:DIR_ROW + 1]
    dir_labels = jnp.zeros_like(best)
    for k in range(1, NUM_DIR_BINS):
        cur = pred[DIR_ROW + k:DIR_ROW + k + 1]
        take = cur > best
        best = jnp.where(take, cur, best)
        dir_labels = jnp.where(take, jnp.float32(k), dir_labels)

    # limit_period + yaw correction (1/period folded to a constant multiply)
    val = rg - DIR_OFFSET
    dir_rot = val - jnp.floor(val * INV_PERIOD + DIR_LIMIT_OFFSET) * PERIOD
    out_ref[0, 6:7, :] = dir_rot + DIR_OFFSET + PERIOD * dir_labels
    out_ref[0, 7:8, :] = jnp.zeros_like(rg)        # keep the pad row defined


# ----------------------------------------------------------------- wrapper
def generate_predicted_boxes(batch_size, cls_preds, box_preds, dir_cls_preds,
                             anchors):
    """cls_preds: (B,H,W,A*num_class), box_preds: (B,H,W,A*7),
    dir_cls_preds: (B,H,W,A*NUM_DIR_BINS), anchors: (NA,7) with NA=H*W*A."""
    B = batch_size
    NA = anchors.shape[0]

    batch_cls_preds = cls_preds.reshape(B, NA, -1).astype(jnp.float32)
    box_enc = box_preds.reshape(B, NA, CODE_SIZE).astype(jnp.float32)
    dir_p = dir_cls_preds.reshape(B, NA, NUM_DIR_BINS).astype(jnp.float32)

    # ---- tile sizing: biggest lane tile that fits the VMEM budget ----------
    NA128 = _round_up(NA, 128)
    num_tiles = -(-NA128 // TA_CAP)
    TA = _round_up(-(-NA128 // num_tiles), 128)
    NA_pad = TA * num_tiles

    # ---- fused, sublane-aligned, channel-major (lane-dense) inputs ---------
    # TODO(synk): for production, emit channel-major activations from the head
    # (and consume channel-major output) to avoid these HBM transposes.
    pred_t = jnp.zeros((B, C_IN, NA_pad), jnp.float32)
    pred_t = pred_t.at[:, 0:CODE_SIZE, :NA].set(jnp.transpose(box_enc, (0, 2, 1)))
    pred_t = pred_t.at[:, DIR_ROW:DIR_ROW + NUM_DIR_BINS, :NA].set(
        jnp.transpose(dir_p, (0, 2, 1)))

    anc = anchors.astype(jnp.float32)
    diag = jnp.sqrt(anc[:, 3] ** 2 + anc[:, 4] ** 2)
    anc_aug = jnp.concatenate([anc, diag[:, None]], axis=-1)        # (NA, 8)
    anc_t = jnp.zeros((C_ANC, NA_pad), jnp.float32)
    anc_t = anc_t.at[:, :NA].set(jnp.transpose(anc_aug, (1, 0)))

    # ---- kernel: grid = (anchor_tile, batch); anchor tile reused across b --
    grid = (num_tiles, B)
    out_t = pl.pallas_call(
        _decode_kernel,
        out_shape=jax.ShapeDtypeStruct((B, C_OUT, NA_pad), jnp.float32),
        grid_spec=pltpu.PrefetchScalarGridSpec(
            num_scalar_prefetch=0,
            grid=grid,
            in_specs=[
                pl.BlockSpec((1, C_IN, TA), lambda t, b: (b, 0, t)),
                pl.BlockSpec((C_ANC, TA), lambda t, b: (0, t)),
            ],
            out_specs=pl.BlockSpec((1, C_OUT, TA), lambda t, b: (b, 0, t)),
        ),
        compiler_params=pltpu.CompilerParams(
            dimension_semantics=("parallel", "parallel"),
            vmem_limit_bytes=32 * 1024 * 1024),
    )(pred_t, anc_t)

    batch_box_preds = jnp.transpose(out_t[:, :CODE_SIZE, :NA], (0, 2, 1))  # (B,NA,7)
    return batch_cls_preds, batch_box_preds


# ----------------------------------------------------------------- reference
def _reference(batch_size, cls_preds, box_preds, dir_cls_preds, anchors):
    B = batch_size
    NA = anchors.shape[0]
    cls_out = np.asarray(cls_preds).reshape(B, NA, -1).astype(np.float32)
    enc = np.asarray(box_preds).reshape(B, NA, CODE_SIZE).astype(np.float32)
    dirp = np.asarray(dir_cls_preds).reshape(B, NA, NUM_DIR_BINS).astype(np.float32)
    anc = np.broadcast_to(np.asarray(anchors)[None], (B, NA, CODE_SIZE))

    xa, ya, za, dxa, dya, dza, ra = [anc[..., i] for i in range(7)]
    xt, yt, zt, dxt, dyt, dzt, rt = [enc[..., i] for i in range(7)]
    diag = np.sqrt(dxa ** 2 + dya ** 2)
    out = np.stack([xt * diag + xa, yt * diag + ya, zt * dza + za,
                    np.exp(dxt) * dxa, np.exp(dyt) * dya, np.exp(dzt) * dza,
                    rt + ra], axis=-1)
    labels = np.argmax(dirp, axis=-1).astype(np.float32)
    val = out[..., 6] - DIR_OFFSET
    dir_rot = val - np.floor(val * INV_PERIOD + DIR_LIMIT_OFFSET) * PERIOD
    out[..., 6] = dir_rot + DIR_OFFSET + PERIOD * labels
    return cls_out, out


# TODO(synk): training-time pieces (target assignment, focal/smooth-L1/dir
# losses) are host/data-dependent and not part of the inference forward path;
# they are not implemented here.

if __name__ == "__main__":
    B, H, W = 2, 16, 16
    key = jax.random.PRNGKey(0)
    k1, k2, k3 = jax.random.split(key, 3)

    cls_preds = jax.random.normal(
        k1, (B, H, W, NUM_ANCHORS_PER_LOC * NUM_CLASS), dtype=jnp.float32)
    box_preds = 0.1 * jax.random.normal(
        k2, (B, H, W, NUM_ANCHORS_PER_LOC * CODE_SIZE), dtype=jnp.float32)
    dir_cls_preds = jax.random.normal(
        k3, (B, H, W, NUM_ANCHORS_PER_LOC * NUM_DIR_BINS), dtype=jnp.float32)

    anchors = generate_anchors(H, W)   # (H*W*A, 7) = (1536, 7)

    batch_cls, batch_box = generate_predicted_boxes(
        B, cls_preds, box_preds, dir_cls_preds, anchors)
    jax.block_until_ready((batch_cls, batch_box))

    ref_cls, ref_box = _reference(B, cls_preds, box_preds, dir_cls_preds, anchors)
    assert batch_cls.shape == (B, H * W * NUM_ANCHORS_PER_LOC, NUM_CLASS)
    assert batch_box.shape == (B, H * W * NUM_ANCHORS_PER_LOC, CODE_SIZE)
    np.testing.assert_allclose(np.asarray(batch_cls), ref_cls, rtol=1e-5, atol=1e-5)
    np.testing.assert_allclose(np.asarray(batch_box), ref_box, rtol=1e-5, atol=1e-5)

    print("KERNEL_OK")
</pallas_src>

<mosaic_0001>
module attributes {stable_mosaic.version = 11 : i64} {
  func.func @_decode_kernel(%arg0: i32, %arg1: i32, %arg2: memref<1x16x1536xf32, #tpu.memory_space<vmem>>, %arg3: memref<8x1536xf32, #tpu.memory_space<vmem>>, %arg4: memref<1x8x1536xf32, #tpu.memory_space<vmem>>) attributes {dimension_semantics = [#tpu.dimension_semantics<parallel>, #tpu.dimension_semantics<parallel>], iteration_bounds = array<i64: 1, 2>, scalar_prefetch = 0 : i64, scratch_operands = 0 : i64, tpu.core_type = #tpu.core_type<tc>, window_params = [{transform_indices = @transform_0, window_bounds = array<i64: 1, 16, 1536>}, {transform_indices = @transform_1, window_bounds = array<i64: 8, 1536>}, {transform_indices = @transform_2, window_bounds = array<i64: 1, 8, 1536>}]} {
    %c0 = arith.constant 0 : index
    %c0_0 = arith.constant 0 : index
    %c0_1 = arith.constant 0 : index
    %0 = vector.load %arg2[%c0, %c0_0, %c0_1] : memref<1x16x1536xf32, #tpu.memory_space<vmem>>, vector<1x16x1536xf32>
    %1 = vector.shape_cast %0 : vector<1x16x1536xf32> to vector<16x1536xf32>
    %c0_2 = arith.constant 0 : index
    %c0_3 = arith.constant 0 : index
    %2 = vector.load %arg3[%c0_2, %c0_3] : memref<8x1536xf32, #tpu.memory_space<vmem>>, vector<8x1536xf32>
    %3 = vector.extract_strided_slice %2 {offsets = [0, 0], sizes = [1, 1536], strides = [1, 1]} : vector<8x1536xf32> to vector<1x1536xf32>
    %4 = vector.extract_strided_slice %2 {offsets = [1, 0], sizes = [1, 1536], strides = [1, 1]} : vector<8x1536xf32> to vector<1x1536xf32>
    %5 = vector.extract_strided_slice %2 {offsets = [2, 0], sizes = [1, 1536], strides = [1, 1]} : vector<8x1536xf32> to vector<1x1536xf32>
    %6 = vector.extract_strided_slice %2 {offsets = [3, 0], sizes = [1, 1536], strides = [1, 1]} : vector<8x1536xf32> to vector<1x1536xf32>
    %7 = vector.extract_strided_slice %2 {offsets = [4, 0], sizes = [1, 1536], strides = [1, 1]} : vector<8x1536xf32> to vector<1x1536xf32>
    %8 = vector.extract_strided_slice %2 {offsets = [5, 0], sizes = [1, 1536], strides = [1, 1]} : vector<8x1536xf32> to vector<1x1536xf32>
    %9 = vector.extract_strided_slice %2 {offsets = [6, 0], sizes = [1, 1536], strides = [1, 1]} : vector<8x1536xf32> to vector<1x1536xf32>
    %10 = vector.extract_strided_slice %2 {offsets = [7, 0], sizes = [1, 1536], strides = [1, 1]} : vector<8x1536xf32> to vector<1x1536xf32>
    %11 = vector.extract_strided_slice %1 {offsets = [0, 0], sizes = [1, 1536], strides = [1, 1]} : vector<16x1536xf32> to vector<1x1536xf32>
    %12 = vector.extract_strided_slice %1 {offsets = [1, 0], sizes = [1, 1536], strides = [1, 1]} : vector<16x1536xf32> to vector<1x1536xf32>
    %13 = vector.extract_strided_slice %1 {offsets = [2, 0], sizes = [1, 1536], strides = [1, 1]} : vector<16x1536xf32> to vector<1x1536xf32>
    %14 = vector.extract_strided_slice %1 {offsets = [3, 0], sizes = [1, 1536], strides = [1, 1]} : vector<16x1536xf32> to vector<1x1536xf32>
    %15 = vector.extract_strided_slice %1 {offsets = [4, 0], sizes = [1, 1536], strides = [1, 1]} : vector<16x1536xf32> to vector<1x1536xf32>
    %16 = vector.extract_strided_slice %1 {offsets = [5, 0], sizes = [1, 1536], strides = [1, 1]} : vector<16x1536xf32> to vector<1x1536xf32>
    %17 = vector.extract_strided_slice %1 {offsets = [6, 0], sizes = [1, 1536], strides = [1, 1]} : vector<16x1536xf32> to vector<1x1536xf32>
    %18 = arith.mulf %11, %10 : vector<1x1536xf32>
    %19 = arith.addf %18, %3 : vector<1x1536xf32>
    %c0_4 = arith.constant 0 : index
    %c0_5 = arith.constant 0 : index
    %c0_6 = arith.constant 0 : index
    %20 = vector.load %arg4[%c0_4, %c0_5, %c0_6] : memref<1x8x1536xf32, #tpu.memory_space<vmem>>, vector<1x1x1536xf32>
    %21 = vector.shape_cast %20 : vector<1x1x1536xf32> to vector<1x1536xf32>
    %22 = vector.shape_cast %19 : vector<1x1536xf32> to vector<1x1x1536xf32>
    tpu.vector_store %arg4[%c0_4, %c0_5, %c0_6], %22 {strides = array<i32>} : memref<1x8x1536xf32, #tpu.memory_space<vmem>>, vector<1x1x1536xf32>,
    %23 = arith.mulf %12, %10 : vector<1x1536xf32>
    %24 = arith.addf %23, %4 : vector<1x1536xf32>
    %c0_7 = arith.constant 0 : index
    %c1 = arith.constant 1 : index
    %c0_8 = arith.constant 0 : index
    %25 = vector.load %arg4[%c0_7, %c1, %c0_8] : memref<1x8x1536xf32, #tpu.memory_space<vmem>>, vector<1x1x1536xf32>
    %26 = vector.shape_cast %25 : vector<1x1x1536xf32> to vector<1x1536xf32>
    %27 = vector.shape_cast %24 : vector<1x1536xf32> to vector<1x1x1536xf32>
    tpu.vector_store %arg4[%c0_7, %c1, %c0_8], %27 {strides = array<i32>} : memref<1x8x1536xf32, #tpu.memory_space<vmem>>, vector<1x1x1536xf32>,
    %28 = arith.mulf %13, %8 : vector<1x1536xf32>
    %29 = arith.addf %28, %5 : vector<1x1536xf32>
    %c0_9 = arith.constant 0 : index
    %c2 = arith.constant 2 : index
    %c0_10 = arith.constant 0 : index
    %30 = vector.load %arg4[%c0_9, %c2, %c0_10] : memref<1x8x1536xf32, #tpu.memory_space<vmem>>, vector<1x1x1536xf32>
    %31 = vector.shape_cast %30 : vector<1x1x1536xf32> to vector<1x1536xf32>
    %32 = vector.shape_cast %29 : vector<1x1536xf32> to vector<1x1x1536xf32>
    tpu.vector_store %arg4[%c0_9, %c2, %c0_10], %32 {strides = array<i32>} : memref<1x8x1536xf32, #tpu.memory_space<vmem>>, vector<1x1x1536xf32>,
    %33 = math.exp %14 : vector<1x1536xf32>
    %34 = arith.mulf %33, %6 : vector<1x1536xf32>
    %c0_11 = arith.constant 0 : index
    %c3 = arith.constant 3 : index
    %c0_12 = arith.constant 0 : index
    %35 = vector.load %arg4[%c0_11, %c3, %c0_12] : memref<1x8x1536xf32, #tpu.memory_space<vmem>>, vector<1x1x1536xf32>
    %36 = vector.shape_cast %35 : vector<1x1x1536xf32> to vector<1x1536xf32>
    %37 = vector.shape_cast %34 : vector<1x1536xf32> to vector<1x1x1536xf32>
    tpu.vector_store %arg4[%c0_11, %c3, %c0_12], %37 {strides = array<i32>} : memref<1x8x1536xf32, #tpu.memory_space<vmem>>, vector<1x1x1536xf32>,
    %38 = math.exp %15 : vector<1x1536xf32>
    %39 = arith.mulf %38, %7 : vector<1x1536xf32>
    %c0_13 = arith.constant 0 : index
    %c4 = arith.constant 4 : index
    %c0_14 = arith.constant 0 : index
    %40 = vector.load %arg4[%c0_13, %c4, %c0_14] : memref<1x8x1536xf32, #tpu.memory_space<vmem>>, vector<1x1x1536xf32>
    %41 = vector.shape_cast %40 : vector<1x1x1536xf32> to vector<1x1536xf32>
    %42 = vector.shape_cast %39 : vector<1x1536xf32> to vector<1x1x1536xf32>
    tpu.vector_store %arg4[%c0_13, %c4, %c0_14], %42 {strides = array<i32>} : memref<1x8x1536xf32, #tpu.memory_space<vmem>>, vector<1x1x1536xf32>,
    %43 = math.exp %16 : vector<1x1536xf32>
    %44 = arith.mulf %43, %8 : vector<1x1536xf32>
    %c0_15 = arith.constant 0 : index
    %c5 = arith.constant 5 : index
    %c0_16 = arith.constant 0 : index
    %45 = vector.load %arg4[%c0_15, %c5, %c0_16] : memref<1x8x1536xf32, #tpu.memory_space<vmem>>, vector<1x1x1536xf32>
    %46 = vector.shape_cast %45 : vector<1x1x1536xf32> to vector<1x1536xf32>
    %47 = vector.shape_cast %44 : vector<1x1536xf32> to vector<1x1x1536xf32>
    tpu.vector_store %arg4[%c0_15, %c5, %c0_16], %47 {strides = array<i32>} : memref<1x8x1536xf32, #tpu.memory_space<vmem>>, vector<1x1x1536xf32>,
    %48 = arith.addf %17, %9 : vector<1x1536xf32>
    %49 = vector.extract_strided_slice %1 {offsets = [8, 0], sizes = [1, 1536], strides = [1, 1]} : vector<16x1536xf32> to vector<1x1536xf32>
    %cst = arith.constant 0.000000e+00 : f32
    %50 = vector.broadcast %cst : f32 to vector<1x1536xf32>
    %51 = vector.extract_strided_slice %1 {offsets = [9, 0], sizes = [1, 1536], strides = [1, 1]} : vector<16x1536xf32> to vector<1x1536xf32>
    %52 = arith.cmpf ogt, %51, %49 : vector<1x1536xf32>
    %cst_17 = arith.constant 1.000000e+00 : f32
    %53 = vector.broadcast %cst_17 : f32 to vector<1x1536xf32>
    %54 = arith.select %52, %53, %50 : vector<1x1536xi1>, vector<1x1536xf32>
    %cst_18 = arith.constant 7.853900e-01 : f32
    %55 = vector.broadcast %cst_18 : f32 to vector<1x1536xf32>
    %56 = arith.subf %48, %55 : vector<1x1536xf32>
    %cst_19 = arith.constant 0.318309873 : f32
    %57 = vector.broadcast %cst_19 : f32 to vector<1x1536xf32>
    %58 = arith.mulf %56, %57 : vector<1x1536xf32>
    %cst_20 = arith.constant 0.000000e+00 : f32
    %59 = vector.broadcast %cst_20 : f32 to vector<1x1536xf32>
    %60 = arith.addf %58, %59 : vector<1x1536xf32>
    %61 = math.floor %60 : vector<1x1536xf32>
    %cst_21 = arith.constant 3.14159274 : f32
    %62 = vector.broadcast %cst_21 : f32 to vector<1x1536xf32>
    %63 = arith.mulf %61, %62 : vector<1x1536xf32>
    %64 = arith.subf %56, %63 : vector<1x1536xf32>
    %cst_22 = arith.constant 7.853900e-01 : f32
    %65 = vector.broadcast %cst_22 : f32 to vector<1x1536xf32>
    %66 = arith.addf %64, %65 : vector<1x1536xf32>
    %cst_23 = arith.constant 3.14159274 : f32
    %67 = vector.broadcast %cst_23 : f32 to vector<1x1536xf32>
    %68 = arith.mulf %67, %54 : vector<1x1536xf32>
    %69 = arith.addf %66, %68 : vector<1x1536xf32>
    %c0_24 = arith.constant 0 : index
    %c6 = arith.constant 6 : index
    %c0_25 = arith.constant 0 : index
    %70 = vector.load %arg4[%c0_24, %c6, %c0_25] : memref<1x8x1536xf32, #tpu.memory_space<vmem>>, vector<1x1x1536xf32>
    %71 = vector.shape_cast %70 : vector<1x1x1536xf32> to vector<1x1536xf32>
    %72 = vector.shape_cast %69 : vector<1x1536xf32> to vector<1x1x1536xf32>
    tpu.vector_store %arg4[%c0_24, %c6, %c0_25], %72 {strides = array<i32>} : memref<1x8x1536xf32, #tpu.memory_space<vmem>>, vector<1x1x1536xf32>,
    %cst_26 = arith.constant 0.000000e+00 : f32
    %73 = vector.broadcast %cst_26 : f32 to vector<1x1536xf32>
    %c0_27 = arith.constant 0 : index
    %c7 = arith.constant 7 : index
    %c0_28 = arith.constant 0 : index
    %74 = vector.load %arg4[%c0_27, %c7, %c0_28] : memref<1x8x1536xf32, #tpu.memory_space<vmem>>, vector<1x1x1536xf32>
    %75 = vector.shape_cast %74 : vector<1x1x1536xf32> to vector<1x1536xf32>
    %76 = vector.shape_cast %73 : vector<1x1536xf32> to vector<1x1x1536xf32>
    tpu.vector_store %arg4[%c0_27, %c7, %c0_28], %76 {strides = array<i32>} : memref<1x8x1536xf32, #tpu.memory_space<vmem>>, vector<1x1x1536xf32>,
    return
  }
  func.func @transform_0(%arg0: i32, %arg1: i32) -> (i32, i32, i32) {
    %c0_i32 = arith.constant 0 : i32
    %c0_i32_0 = arith.constant 0 : i32
    return %arg1, %c0_i32, %arg0 : i32, i32, i32
  }
  func.func @transform_1(%arg0: i32, %arg1: i32) -> (i32, i32) {
    %c0_i32 = arith.constant 0 : i32
    %c0_i32_0 = arith.constant 0 : i32
    return %c0_i32, %arg0 : i32, i32
  }
  func.func @transform_2(%arg0: i32, %arg1: i32) -> (i32, i32, i32) {
    %c0_i32 = arith.constant 0 : i32
    %c0_i32_0 = arith.constant 0 : i32
    return %arg1, %c0_i32, %arg0 : i32, i32, i32
  }
}

</mosaic_0001>

<bundles_post_ra>
// kernel: tpu_custom_call.1
= control target key start
LH: loop header
LB: loop body
LE: loop exit
PB: predicated region body
PF: predicated region fallthrough
CT: control target
= control target key end

     0   :  { %7 = vsyncpa [#allocation3], 0  ;;  %s2354_s0 = inlined_call_operand.hbm [shape: f32[2,16,1536], index: 0, kind: input, shape index: {}]   ;;  %s2355_s1 = inlined_call_operand.hbm [shape: f32[8,1536], index: 1, kind: input, shape index: {}]   ;;  %s2356_s2 = inlined_call_operand.hbm [shape: f32[2,8,1536], index: 2, kind: output, shape index: {}]  }
   0x1   :  { %9 = vsyncpa [#allocation3 + $0x1], 0 }
   0x2   :  { %10 = vsyncpa [#allocation6], 0 }
   0x3   :  { %11 = vsyncpa [#allocation4], 0 }
   0x4   :  { %13 = vsyncpa [#allocation4 + $0x1], 0  ;;  %s1671_s9 = smov 0   ;;  %s1673_s10 = smov 0  }
   0x5   :  { %s1675_s11 = smov 0   ;;  %s1677_s12 = smov 0  }
   0x6   :  { %s1679_s13 = smov 0   ;;  %s1681_s14 = smov 0  }
   0x7 LB: > { %s1352_s15 = sadd.s32 4294967295, %s1647_s14   ;;  %s1353_s16 = sadd.s32 4294967294, %s1647_s14   ;;  %s1647_s14 = sphi %s1681_s14, %s19_s14   ;;  %s1643_s13 = sphi %s1679_s13, %s2402_s13   ;;  %s1639_s12 = sphi %s1677_s12, %s2401_s12   ;;  %s1635_s11 = sphi %s1675_s11, %s2400_s11   ;;  %s1631_s10 = sphi %s1673_s10, %s2399_s10   ;;  %s1627_s9 = sphi %s1671_s9, %s2398_s9  }
   0x8   : > { %s40_s17 = sadd.s32 1, %s1635_s11  ;;  %p47_p0 = scmp.ne.s32.totalorder %s1635_s11, %s1631_s10 }
   0x9   : > { %p48_p1 = scmp.eq.s32.totalorder %s1647_s14, 0  ;;  %p53_p2 = scmp.ne.s32.totalorder %s1631_s10, %s1627_s9 }
   0xa   : > { %p1709_p3 = scmp.eq.s32.totalorder %s1352_s15, 0  ;;  %p105_p4 = scmp.eq.s32.totalorder %s1352_s15, 1 }
   0xb   : > { %p1713_p5 = por %p48_p1, %p47_p0  ;;  %p111_p6 = scmp.eq.s32.totalorder %s1353_s16, 1 }
   0xc   : > { %s2363_s18 = scalar_select %p1709_p3, 1, 0 }
   0xd   : > { %p1719_p7 = por %p1709_p3, %p53_p2  ;;  %p1723_p8 = por %p105_p4, %p47_p0 }
   0xe   : > { %p1727_p9 = por %p111_p6, %p53_p2  ;;  %p1354_p10 = scmp.ge.s32.totalorder %s1647_s14, 1 }
   0xf   : > { %s2365_s20 = scalar_select %p1719_p7, 1, 0 }
  0x10   : > { %s2366_s21 = scalar_select %p1723_p8, 1, 0 }
  0x11   : > { %s2367_s22 = scalar_select %p1727_p9, 1, 0 }
  0x12   : > { %p118_p11 = scmp.lt.s32.totalorder %s1647_s14, 3  ;;  %s1649_s24 = smov [#allocation5]  }
  0x13   : > { %s134_s25 = sshll.u32 %s1649_s24, 4  ;;  %p1423_p1 = scmp.lt.s32.totalorder %s1647_s14, 2  ;;  %s135_s25 = int_to_ptr.vmem [resolvable:$true] %s134_s25 }
  0x14   : > { %p1734_p13 = pnand %p1354_p10, %p118_p11  ;;  %s28_s28 = sadd.s32 1, %s1643_s13 }
  0x15   : > { %p1743_p4 = pnand %p1423_p1, %p1713_p5  ;;  %p1754_p6 = scmp.ge.s32.totalorder %s28_s28, 2 }
  0x16   : > { %s2368_s23 = scalar_select %p1734_p13, 1, 0 }
  0x17   : > { %p1410_p0 = pneg %p1734_p13  ;;  %s145_s30 = sand.u32 1, %s1635_s11  }
  0x18   : > { %s2369_s26 = scalar_select %p1743_p4, 1, 0 }
  0x19   : > { %p1749_p2 = pnand %p1410_p0, %p1709_p3  ;;  %s1503_s5 = scalar_lea.hbm %s2355_s1, 1536 }
  0x1a   : > { %s2371_s29 = scalar_select %p1754_p6, 1, 0 }
  0x1b   : > { %p1504_p5 = scmp.ne.s32.totalorder %s2355_s1, %s1503_s5  ;;  %p1505_p10 = pneg %p1749_p2 }
  0x1c   : > { %p1510_p0 = scmp.lt.u32.totalorder %s1503_s5, %s2355_s1 }
  0x1d   : > { %p1506_p11 = pnand %p1505_p10, %p1504_p5 }
  0x1f   : > { %p1507_p1 = pneg %p1506_p11 }
  0x21   : > { %p1512_p12 = pnand %p1510_p0, %p1507_p1 }
  0x23   : > { %1515 = shalt.err (!%p1512_p12)
}
  0x24   : > { %s1516_s16 = scalar_lea.vmem %s135_s25, 1536  ;;  %p1524_p7 = scmp.lt.s32.totalorder %s135_s25, %s135_s25 }
  0x25   : > { %p1517_p9 = scmp.ne.s32.totalorder %s135_s25, %s1516_s16  ;;  %p1525_p13 = scmp.lt.s32.totalorder %s1516_s16, %s1516_s16 }
  0x27   : > { %p1519_p8 = pnand %p1517_p9, %p1505_p10  ;;  %p1526_p4 = por %p1525_p13, %p1524_p7 }
  0x29   : > { %p1520_p3 = pneg %p1519_p8 }
  0x2b   : > { %p1527_p6 = pnand %p1526_p4, %p1520_p3 }
  0x2d   : > { %1530 = shalt.err (!%p1527_p6)
}
  0x2e   : > { %1413 = dma.hbm_to_vmem [thread:$0]  (!%p1749_p2), %s2355_s1, 1536, %s135_s25, [#allocation6]  }
  0x2f   : > { %p2372_p9 = scmp.ne.s32.totalorder %s2371_s29, 0  ;;  %s1397_s3 = smul.u32 192, %s145_s30 }
  0x30   : > { %s1398_s5 = smul.u32 3072, %s1643_s13  ;;  %s1794_s29 = scalar_lea.sflag [#allocation3], %s145_s30 }
  0x31   : > { %s2404_s28 = smov (%p2372_p9, %s28_s28), 0  ;;  %s149_s8 = scalar_lea.vmem [#allocation2], %s1397_s3 }
  0x32   : > { %s35_s4 = ssub.s32 %s1643_s13, %s2404_s28  ;;  %s1785_s7 = scalar_lea.hbm %s2354_s0, %s1398_s5 }
  0x33   : > { %p38_p3 = scmp.eq.s32.totalorder %s35_s4, 0  ;;  %s158_s15 = sshll.u32 %s149_s8, 4  ;;  %s1792_s15 = int_to_ptr.vmem [resolvable:$true] %s158_s15 }
  0x34   : > { %s1531_s16 = scalar_lea.hbm %s1785_s7, 3072  ;;  %p2373_p8 = scmp.ne.s32.totalorder %s2369_s26, 0 }
  0x35   : > { %s1790_s25 = scalar_select %p38_p3, %s1635_s11, %s40_s17  }
  0x36   : > { %p1532_p7 = scmp.ne.s32.totalorder %s1785_s7, %s1531_s16  ;;  %p1533_p12 = pneg %p2373_p8 }
  0x37   : > { %s1536_s3 = scalar_lea.hbm %s2354_s0, 6144  ;;  %p1537_p2 = scmp.lt.u32.totalorder %s1785_s7, %s2354_s0 }
  0x38   : > { %p1534_p13 = pnand %p1533_p12, %p1532_p7  ;;  %p1538_p6 = scmp.lt.u32.totalorder %s1536_s3, %s1531_s16 }
  0x39   : > { %p1540_p10 = scmp.lt.u32.totalorder %s1531_s16, %s1785_s7 }
  0x3a   : > { %p1535_p4 = pneg %p1534_p13  ;;  %p1539_p5 = por %p1538_p6, %p1537_p2 }
  0x3c   : > { %p1541_p11 = por %p1540_p10, %p1539_p5 }
  0x3e   : > { %p1542_p1 = pnand %p1541_p11, %p1535_p4 }
  0x40   : > { %1545 = shalt.err (!%p1542_p1)
}
  0x41   : > { %s1546_s17 = scalar_lea.vmem %s1792_s15, 3072  ;;  %s1650_s30 = smov [#allocation2]  }
  0x42   : > { %p1547_p0 = scmp.ne.s32.totalorder %s1792_s15, %s1546_s17  ;;  %s1551_s27 = sshll.u32 %s1650_s30, 4  ;;  %s1552_s27 = int_to_ptr.vmem [resolvable:$false] %s1551_s27 }
  0x43   : > { %s1553_s6 = scalar_lea.vmem %s1552_s27, 6144  ;;  %p1554_p7 = scmp.lt.s32.totalorder %s1792_s15, %s1552_s27 }
  0x44   : > { %p1549_p9 = pnand %p1547_p0, %p1533_p12  ;;  %p1555_p13 = scmp.lt.s32.totalorder %s1553_s6, %s1546_s17 }
  0x46   : > { %p1550_p3 = pneg %p1549_p9  ;;  %p1556_p2 = por %p1555_p13, %p1554_p7 }
  0x48   : > { %p1557_p6 = pnand %p1556_p2, %p1550_p3 }
  0x4a   : > { %1560 = shalt.err (!%p1557_p6)
}
  0x4b   : > { %s1651_s8 = smov 1536   ;;  %s1652_s16 = smov 96  }
  0x4c   : > { %1417 = dma.hbm_to_vmem [thread:$0]  (!%p2373_p8), %s1785_s7, 3072, %s1792_s15, %s1794_s29, %s1651_s8, %s1651_s8, %s1652_s16  }
  0x4d   : > { %p2374_p12 = scmp.ne.s32.totalorder %s2368_s23, 0 }
  0x4e   : > { %s1825_s19 = sand.u32 (!%p2374_p12), 1, %s1631_s10   ;;  %p2375_p4 = scmp.ne.s32.totalorder (!%p2374_p12), %s2365_s20, 0 }
  0x4f   : > { %170 = sbr.rel (%p2374_p12) target bundleno = 233 (0xe9), region = 28  ;;  %s173_s3 = scalar_lea.sflag (!%p2374_p12), [#allocation3], %s1825_s19 }
  0x50   : > { %s1399_s24 = smul.u32 (!%p2374_p12), 192, %s1825_s19 }
  0x52   : > { %s1829_s4 = scalar_lea.vmem (!%p2374_p12), [#allocation2], %s1399_s24 }
  0x56   : > { %1614 = dma.done.wait (%p2375_p4), %s173_s3, 3072  }
  0x57   : > { %1616 = vsyncadd (%p2375_p4), %s173_s3, 4294964224  ;;  %p2376_p8 = scmp.ne.s32.totalorder %s2363_s18, 0 }
  0x59   : > { %1618 = dma.done.wait (%p2376_p8), [#allocation6], 1536  }
  0x5a   : > { %1620 = vsyncadd (%p2376_p8), [#allocation6], 4294965760  ;;  %s1400_s23 = smul.u32 96, %s1825_s19  ;;  %v319_v0 = vlaneseq  ;;  %v1653_v1 = vmov 1966171168   ;;  %v1654_v4 = vmov 0.0  }
  0x5b   : > { %v317_v2 = vunpack.c.l.s4 %v1653_v1  ;;  %v1855_v7 = vld [vmem:[%s1829_s4] sm:$0xff]  ;;  %v1858_v8 = vld [vmem:[%s1829_s4 + $0x8] sm:$0xff]  ;;  %v1868_v14 = vld [vmem:[#allocation5 + $0x10] sm:$0xff]  ;;  %s1401_s18 = smul.u32 1536, %s1639_s12  ;;  %s1240_s5 = scalar_lea.sflag [#allocation4], %s1825_s19 }
  0x5c   : > { %vm1840_vm0 = vcmp.lt.s32.totalorder %v319_v0, 512  ;;  %s1844_s26 = scalar_lea.vmem [#allocation7], %s1400_s23  ;;  %v320_v6 = vshrl.u32 %v319_v0, 7  ;;  %v679_v9 = vmul.f32 1.442695, %v1855_v7  ;;  %v1861_v10 = vld [vmem:[#allocation5] sm:$0xff] }
  0x5d   : > { %1391 = vst [vmem:[%s1844_s26 + $0x7] ss:$8 sm:$0xf] %v1654_v4  ;;  %1392 = vst [vmem:[%s1844_s26 + $0x7] ss:$8 sm:$0xf0] %v1654_v4  ;;  %v318_v5 = vunpack.c.0.s8 %v317_v2  ;;  %s2302_s29 = scalar_lea.hbm %s2356_s2, %s1401_s18 }
  0x5e   : > { %1393 = vst.msk [vmem:[%s1844_s26 + $0x47] ss:$8 sm:$0xf] %vm1840_vm0, %v1654_v4  ;;  %v681_v12 = vmul.f32 1.442695, %v1858_v8  ;;  %v1866_v13 = vld [vmem:[#allocation5 + $0x8] sm:$0xff]  ;;  %1479 = vpow2.f32 %v679_v9 }
  0x5f   : > { %v1863_v11 = vsub.s32 %v318_v5, %v320_v6  ;;  %v1870_v15 = vld [vmem:[#allocation5 + $0x18] sm:$0xff]  ;;  %v252_v16 = vrot.slane %v1861_v10, 7  ;;  %v396_v17 = vrot.slane %v1861_v10, 6  ;;  %v537_v18 = vrot.slane %v1861_v10, 3  ;;  %v1875_v19 = vld [vmem:[#allocation5 + $0x20] sm:$0xff]  ;;  %v1877_v20 = vld [vmem:[#allocation5 + $0x28] sm:$0xff] }
  0x60   : > { %v1879_v21 = vld [vmem:[#allocation5 + $0x30] sm:$0xff]  ;;  %v253_v22 = vrot.slane %v1866_v13, 7  ;;  %v254_v23 = vrot.slane %v1868_v14, 7  ;;  %v255_v24 = vrot.slane %v1870_v15, 7  ;;  %1481 = vpow2.f32 %v681_v12  ;;  %v1888_v26 = vld [vmem:[%s1829_s4 + $0x18] sm:$0xff]  ;;  %v1897_v32 = vld [vmem:[%s1829_s4 + $0x20] sm:$0xff] }
  0x61   : > { %v1885_v25 = vld [vmem:[%s1829_s4 + $0x10] sm:$0xff]  ;;  %v1890_v27 = vld [vmem:[#allocation5 + $0x38] sm:$0xff]  ;;  %v256_v28 = vrot.slane %v1875_v19, 7  ;;  %v257_v29 = vrot.slane %v1877_v20, 7  ;;  %v258_v30 = vrot.slane %v1879_v21, 7  ;;  %v276_v31 = vmul.f32 %v252_v16, %v1855_v7  ;;  %v1900_v33 = vld [vmem:[%s1829_s4 + $0x28] sm:$0xff] }
  0x62   : > { %v1903_v34 = vld [vmem:[%s1829_s4 + $0x30] sm:$0xff]  ;;  %v259_v35 = vrot.slane %v1890_v27, 7  ;;  %v277_v36 = vmul.f32 %v253_v22, %v1858_v8  ;;  %v278_v37 = vmul.f32 %v254_v23, %v1885_v25  ;;  %v279_v38 = vmul.f32 %v255_v24, %v1888_v26  ;;  %v1910_v39 = vld [vmem:[%s1829_s4 + $0x38] sm:$0xff]  ;;  %v1920_v48 = vld [vmem:[#allocation5 + $0x40] sm:$0xff]  ;;  %s1256_s20 = sshll.u32 %s1844_s26, 4  ;;  %p2395_p10 = scmp.ne.s32.totalorder %s2366_s21, 0  ;;  %s2304_s20 = int_to_ptr.vmem [resolvable:$true] %s1256_s20 }
  0x63   : > { %v280_v40 = vmul.f32 %v256_v28, %v1897_v32  ;;  %v281_v41 = vmul.f32 %v257_v29, %v1900_v33  ;;  %v282_v42 = vmul.f32 %v258_v30, %v1903_v34  ;;  %v288_v43 = vadd.f32 %v276_v31, %v1861_v10  ;;  %v1925_v52 = vld [vmem:[#allocation5 + $0x48] sm:$0xff]  ;;  %v1930_v57 = vld [vmem:[%s1829_s4 + $0x40] sm:$0xff]  ;;  %v1932_v58 = vld [vmem:[#allocation5 + $0x50] sm:$0xff]  ;;  %s1561_s17 = scalar_lea.vmem %s2304_s20, 1536  ;;  %s1655_s12 = smov [#allocation7]  }
  0x64   : > { %v283_v44 = vmul.f32 %v259_v35, %v1910_v39  ;;  %v289_v45 = vadd.f32 %v277_v36, %v1866_v13  ;;  %v290_v46 = vadd.f32 %v278_v37, %v1868_v14  ;;  %v291_v47 = vadd.f32 %v279_v38, %v1870_v15  ;;  %v1934_v59 = vld [vmem:[#allocation5 + $0x58] sm:$0xff]  ;;  %v1938_v62 = vld [vmem:[%s1829_s4 + $0x48] sm:$0xff]  ;;  %v1946_v9 = vld [vmem:[%s1829_s4 + $0x50] sm:$0xff]  ;;  %p1562_p5 = scmp.ne.s32.totalorder %s2304_s20, %s1561_s17  ;;  %s1565_s30 = sshll.u32 %s1655_s12, 4  ;;  %s1566_s30 = int_to_ptr.vmem [resolvable:$false] %s1565_s30 }
  0x65   : > { %v292_v49 = vadd.f32 %v280_v40, %v1875_v19  ;;  %v293_v50 = vadd.f32 %v281_v41, %v1877_v20  ;;  %v294_v51 = vadd.f32 %v282_v42, %v1879_v21  ;;  %v260_v53 = vrot.slane %v1920_v48, 7  ;;  %v1949_v12 = vld [vmem:[%s1829_s4 + $0x58] sm:$0xff]  ;;  %s1567_s27 = scalar_lea.vmem %s1566_s30, 3072  ;;  %p1568_p0 = scmp.lt.s32.totalorder %s2304_s20, %s1566_s30 }
  0x66   : > { %v295_v54 = vadd.f32 %v283_v44, %v1890_v27  ;;  %v312_v55 = vcombine.low %v288_v43, %v289_v45  ;;  %v313_v56 = vcombine.low %v290_v46, %v291_v47  ;;  %v261_v60 = vrot.slane %v1925_v52, 7  ;;  %p1563_p11 = pnand %p1562_p5, %p2395_p10  ;;  %p1569_p9 = scmp.lt.s32.totalorder %s1567_s27, %s1561_s17 }
  0x67   : > { %v314_v61 = vcombine.low %v292_v49, %v293_v50  ;;  %v262_v63 = vrot.slane %v1932_v58, 7  ;;  %v263_v0 = vrot.slane %v1934_v59, 7  ;;  %v284_v1 = vmul.f32 %v260_v53, %v1930_v57 }
  0x68   : > { %v315_v2 = vcombine.low %v294_v51, %v295_v54  ;;  %v322_v5 = vrot.slane %v312_v55, %v1863_v11  ;;  %v329_v6 = vrot.slane %v313_v56, %v1863_v11  ;;  %v285_v16 = vmul.f32 %v261_v60, %v1938_v62  ;;  %v1952_v22 = vpop.eup %1479  ;;  %p1564_p1 = pneg %p1563_p11  ;;  %p1570_p3 = por %p1569_p9, %p1568_p0 }
  0x69   : > { %v336_v23 = vrot.slane %v314_v61, %v1863_v11  ;;  %v286_v24 = vmul.f32 %v262_v63, %v1946_v9  ;;  %v287_v28 = vmul.f32 %v263_v0, %v1949_v12  ;;  %v296_v29 = vadd.f32 %v284_v1, %v1920_v48 }
  0x6a   : > { %v1958_v30 = vpop.eup %1481  ;;  %v343_v31 = vrot.slane %v315_v2, %v1863_v11  ;;  %v344_v35 = vcombine.low %v322_v5, %v329_v6  ;;  %v297_v36 = vadd.f32 %v285_v16, %v1925_v52  ;;  %v397_v37 = vrot.slane %v1866_v13, 6  ;;  %p1571_p7 = pnand %p1570_p3, %p1564_p1 }
  0x6b   : > { %v298_v38 = vadd.f32 %v286_v24, %v1932_v58  ;;  %v299_v40 = vadd.f32 %v287_v28, %v1934_v59  ;;  %v398_v41 = vrot.slane %v1868_v14, 6  ;;  %v399_v42 = vrot.slane %v1870_v15, 6 }
  0x6c   : > { %v345_v43 = vcombine.low %v336_v23, %v343_v31  ;;  %v352_v44 = vrot.slane %v344_v35, %v1863_v11  ;;  %v361_v45 = vcombine.low %v296_v29, %v297_v36  ;;  %v400_v46 = vrot.slane %v1875_v19, 6 }
  0x6d   : > { %v362_v47 = vcombine.low %v298_v38, %v299_v40  ;;  %v401_v49 = vrot.slane %v1877_v20, 6  ;;  %v402_v50 = vrot.slane %v1879_v21, 6  ;;  %v403_v51 = vrot.slane %v1890_v27, 6 }
  0x6e   : > { %v359_v53 = vrot.slane %v345_v43, %v1863_v11  ;;  %v369_v54 = vrot.slane %v361_v45, %v1863_v11  ;;  %v420_v55 = vmul.f32 %v396_v17, %v1855_v7  ;;  %v421_v56 = vmul.f32 %v397_v37, %v1858_v8 }
  0x6f   : > { %v376_v60 = vrot.slane %v362_v47, %v1863_v11  ;;  %v422_v61 = vmul.f32 %v398_v41, %v1885_v25  ;;  %v423_v63 = vmul.f32 %v399_v42, %v1888_v26  ;;  %v424_v0 = vmul.f32 %v400_v46, %v1897_v32 }
  0x70   : > { %v360_v1 = vcombine.low %v352_v44, %v359_v53  ;;  %v425_v2 = vmul.f32 %v401_v49, %v1900_v33  ;;  %v426_v5 = vmul.f32 %v402_v50, %v1903_v34  ;;  %v427_v6 = vmul.f32 %v403_v51, %v1910_v39 }
  0x71   : > { %v377_v16 = vcombine.low %v369_v54, %v376_v60  ;;  %v432_v17 = vadd.f32 %v420_v55, %v1861_v10  ;;  %v433_v23 = vadd.f32 %v421_v56, %v1866_v13  ;;  %v434_v24 = vadd.f32 %v422_v61, %v1868_v14 }
  0x72   : > { %387 = vst [vmem:[%s1844_s26] ss:$8 sm:$0xf] %v360_v1  ;;  %388 = vst [vmem:[%s1844_s26] ss:$8 sm:$0xf0] %v360_v1  ;;  %v435_v28 = vadd.f32 %v423_v63, %v1870_v15  ;;  %v436_v29 = vadd.f32 %v424_v0, %v1875_v19  ;;  %v437_v31 = vadd.f32 %v425_v2, %v1877_v20  ;;  %v404_v40 = vrot.slane %v1920_v48, 6 }
  0x73   : > { %v438_v35 = vadd.f32 %v426_v5, %v1879_v21  ;;  %v384_v36 = vrot.slane %v377_v16, %v1863_v11  ;;  %v439_v37 = vadd.f32 %v427_v6, %v1890_v27  ;;  %v456_v38 = vcombine.low %v432_v17, %v433_v23 }
  0x74   : > { %v457_v41 = vcombine.low %v434_v24, %v435_v28  ;;  %v458_v42 = vcombine.low %v436_v29, %v437_v31  ;;  %v405_v43 = vrot.slane %v1925_v52, 6  ;;  %v406_v44 = vrot.slane %v1932_v58, 6 }
  0x75   : > { %1360 = vst.msk [vmem:[%s1844_s26 + $0x40] ss:$8 sm:$0xf] %vm1840_vm0, %v384_v36  ;;  %v459_v45 = vcombine.low %v438_v35, %v439_v37  ;;  %v466_v46 = vrot.slane %v456_v38, %v1863_v11  ;;  %v407_v47 = vrot.slane %v1934_v59, 6  ;;  %v428_v49 = vmul.f32 %v404_v40, %v1930_v57 }
  0x76   : > { %v473_v50 = vrot.slane %v457_v41, %v1863_v11  ;;  %v480_v51 = vrot.slane %v458_v42, %v1863_v11  ;;  %v429_v53 = vmul.f32 %v405_v43, %v1938_v62  ;;  %v430_v54 = vmul.f32 %v406_v44, %v1946_v9 }
  0x77   : > { %v487_v55 = vrot.slane %v459_v45, %v1863_v11  ;;  %v431_v56 = vmul.f32 %v407_v47, %v1949_v12  ;;  %v440_v60 = vadd.f32 %v428_v49, %v1920_v48  ;;  %v538_v61 = vrot.slane %v1866_v13, 3 }
  0x78   : > { %v488_v63 = vcombine.high %v466_v46, %v473_v50  ;;  %v441_v0 = vadd.f32 %v429_v53, %v1925_v52  ;;  %v442_v1 = vadd.f32 %v430_v54, %v1932_v58  ;;  %v539_v2 = vrot.slane %v1868_v14, 3 }
  0x79   : > { %v489_v5 = vcombine.high %v480_v51, %v487_v55  ;;  %v443_v6 = vadd.f32 %v431_v56, %v1934_v59  ;;  %v540_v16 = vrot.slane %v1870_v15, 3  ;;  %v541_v17 = vrot.slane %v1875_v19, 3 }
  0x7a   : > { %v496_v23 = vrot.slane %v488_v63, %v1863_v11  ;;  %v505_v24 = vcombine.low %v440_v60, %v441_v0  ;;  %v542_v28 = vrot.slane %v1877_v20, 3  ;;  %v543_v29 = vrot.slane %v1879_v21, 3 }
  0x7b   : > { %v503_v31 = vrot.slane %v489_v5, %v1863_v11  ;;  %v506_v35 = vcombine.low %v442_v1, %v443_v6  ;;  %v544_v36 = vrot.slane %v1890_v27, 3  ;;  %v561_v37 = vmul.f32 %v537_v18, %v1855_v7 }
  0x7c   : > { %v513_v38 = vrot.slane %v505_v24, %v1863_v11  ;;  %v562_v40 = vmul.f32 %v538_v61, %v1858_v8  ;;  %v563_v41 = vmul.f32 %v539_v2, %v1885_v25  ;;  %v564_v42 = vmul.f32 %v540_v16, %v1888_v26 }
  0x7d   : > { %v504_v43 = vcombine.low %v496_v23, %v503_v31  ;;  %v520_v44 = vrot.slane %v506_v35, %v1863_v11  ;;  %v565_v45 = vmul.f32 %v541_v17, %v1897_v32  ;;  %v566_v46 = vmul.f32 %v542_v28, %v1900_v33 }
  0x7e   : > { %v567_v47 = vmul.f32 %v543_v29, %v1903_v34  ;;  %v568_v49 = vmul.f32 %v544_v36, %v1910_v39  ;;  %v573_v18 = vadd.f32 %v561_v37, %v1861_v10  ;;  %v574_v50 = vadd.f32 %v562_v40, %v1866_v13 }
  0x7f   : > { %1361 = vst [vmem:[%s1844_s26 + $0x1] ss:$8 sm:$0xf] %v504_v43  ;;  %1362 = vst [vmem:[%s1844_s26 + $0x1] ss:$8 sm:$0xf0] %v504_v43  ;;  %v521_v51 = vcombine.high %v513_v38, %v520_v44  ;;  %v575_v53 = vadd.f32 %v563_v41, %v1868_v14  ;;  %v576_v54 = vadd.f32 %v564_v42, %v1870_v15 }
  0x80   : > { %v577_v55 = vadd.f32 %v565_v45, %v1875_v19  ;;  %v578_v56 = vadd.f32 %v566_v46, %v1877_v20  ;;  %v579_v60 = vadd.f32 %v567_v47, %v1879_v21  ;;  %v580_v61 = vadd.f32 %v568_v49, %v1890_v27 }
  0x81   : > { %v597_v63 = vcombine.low %v573_v18, %v574_v50  ;;  %v528_v0 = vrot.slane %v521_v51, %v1863_v11  ;;  %v598_v1 = vcombine.low %v575_v53, %v576_v54  ;;  %v545_v2 = vrot.slane %v1920_v48, 3 }
  0x82   : > { %v546_v5 = vrot.slane %v1925_v52, 3  ;;  %v599_v6 = vcombine.low %v577_v55, %v578_v56  ;;  %v600_v16 = vcombine.low %v579_v60, %v580_v61  ;;  %v547_v23 = vrot.slane %v1932_v58, 3 }
  0x83   : > { %v607_v17 = vrot.slane %v597_v63, %v1863_v11  ;;  %1363 = vst.msk [vmem:[%s1844_s26 + $0x41] ss:$8 sm:$0xf] %vm1840_vm0, %v528_v0  ;;  %v614_v24 = vrot.slane %v598_v1, %v1863_v11  ;;  %v548_v28 = vrot.slane %v1934_v59, 3  ;;  %v569_v29 = vmul.f32 %v545_v2, %v1930_v57 }
  0x84   : > { %v570_v31 = vmul.f32 %v546_v5, %v1938_v62  ;;  %v621_v35 = vrot.slane %v599_v6, %v1863_v11  ;;  %v628_v36 = vrot.slane %v600_v16, %v1863_v11  ;;  %v571_v37 = vmul.f32 %v547_v23, %v1946_v9  ;;  %v216_v23 = vld [vmem:[%s1829_s4 + $0x60] sm:$0xff] }
  0x85   : > { %v683_v38 = vmul.f32 1.442695, %v1885_v25  ;;  %v629_v40 = vcombine.low %v607_v17, %v614_v24  ;;  %v572_v41 = vmul.f32 %v548_v28, %v1949_v12  ;;  %v581_v42 = vadd.f32 %v569_v29, %v1920_v48 }
  0x86   : > { %v582_v43 = vadd.f32 %v570_v31, %v1925_v52  ;;  %v630_v44 = vcombine.low %v621_v35, %v628_v36  ;;  %v583_v45 = vadd.f32 %v571_v37, %v1932_v58  ;;  %v685_v46 = vmul.f32 1.442695, %v1888_v26  ;;  %v219_v35 = vld [vmem:[%s1829_s4 + $0x78] sm:$0xff] }
  0x87   : > { %1483 = vpow2.f32 %v683_v38  ;;  %v637_v47 = vrot.slane %v629_v40, %v1863_v11  ;;  %v584_v49 = vadd.f32 %v572_v41, %v1934_v59  ;;  %v687_v50 = vmul.f32 1.442695, %v1897_v32 }
  0x88   : > { %v646_v18 = vcombine.low %v581_v42, %v582_v43  ;;  %v644_v51 = vrot.slane %v630_v44, %v1863_v11  ;;  %1485 = vpow2.f32 %v685_v46  ;;  %v689_v53 = vmul.f32 1.442695, %v1900_v33  ;;  %v222_v42 = vld [vmem:[%s1829_s4 + $0x90] sm:$0xff]  ;;  %v223_v43 = vld [vmem:[%s1829_s4 + $0x98] sm:$0xff] }
  0x89   : > { %v691_v54 = vmul.f32 1.442695, %v1903_v34  ;;  %v647_v55 = vcombine.low %v583_v45, %v584_v49  ;;  %1487 = vpow2.f32 %v687_v50  ;;  %v693_v60 = vmul.f32 1.442695, %v1910_v39 }
  0x8a   : > { %v654_v56 = vrot.slane %v646_v18, %v1863_v11  ;;  %v645_v61 = vcombine.high %v637_v47, %v644_v51  ;;  %1489 = vpow2.f32 %v689_v53  ;;  %v703_v63 = vmul.f32 %v1952_v22, %v1861_v10 }
  0x8b   : > { %v704_v0 = vmul.f32 %v1958_v30, %v1866_v13  ;;  %v661_v1 = vrot.slane %v647_v55, %v1863_v11  ;;  %1491 = vpow2.f32 %v691_v54  ;;  %v695_v2 = vmul.f32 1.442695, %v1930_v57 }
  0x8c   : > { %v697_v5 = vmul.f32 1.442695, %v1938_v62  ;;  %1364 = vst [vmem:[%s1844_s26 + $0x2] ss:$8 sm:$0xf] %v645_v61  ;;  %1493 = vpow2.f32 %v693_v60  ;;  %v2088_v30 = vadd.f32 %v1861_v10, %v1855_v7  ;;  %v2093_v24 = vadd.f32 %v1866_v13, %v1858_v8  ;;  %v217_v7 = vld [vmem:[%s1829_s4 + $0x68] sm:$0xff] }
  0x8d   : > { %1365 = vst [vmem:[%s1844_s26 + $0x2] ss:$8 sm:$0xf0] %v645_v61  ;;  %v699_v6 = vmul.f32 1.442695, %v1946_v9  ;;  %v662_v16 = vcombine.low %v654_v56, %v661_v1  ;;  %1495 = vpow2.f32 %v695_v2  ;;  %v727_v17 = vcombine.low %v703_v63, %v704_v0  ;;  %v218_v10 = vld [vmem:[%s1829_s4 + $0x70] sm:$0xff] }
  0x8e   : > { %v701_v22 = vmul.f32 1.442695, %v1949_v12  ;;  %1497 = vpow2.f32 %v697_v5  ;;  %v2097_v28 = vadd.f32 %v1868_v14, %v1885_v25  ;;  %v809_v31 = vcombine.high %v703_v63, %v704_v0  ;;  %v220_v8 = vld [vmem:[%s1829_s4 + $0x80] sm:$0xff]  ;;  %v221_v13 = vld [vmem:[%s1829_s4 + $0x88] sm:$0xff] }
  0x8f   : > { %v669_v29 = vrot.slane %v662_v16, %v1863_v11  ;;  %1499 = vpow2.f32 %v699_v6  ;;  %v2105_v36 = vadd.f32 %v1870_v15, %v1888_v26  ;;  %v2111_v25 = vadd.f32 %v1875_v19, %v1897_v32 }
  0x90   : > { %1501 = vpow2.f32 %v701_v22  ;;  %v2115_v38 = vadd.f32 %v1877_v20, %v1900_v33  ;;  %v2119_v40 = vadd.f32 %v1879_v21, %v1903_v34  ;;  %v2126_v44 = vadd.f32 %v1890_v27, %v1910_v39 }
  0x91   : > { %v1484_v37 = vpop.eup %1483  ;;  %v670_v41 = vcombine.high %v669_v29, %v669_v29  ;;  %v947_v45 = vrot.slane %v216_v23, 7  ;;  %v948_v46 = vrot.slane %v217_v7, 7  ;;  %v949_v47 = vrot.slane %v218_v10, 7 }
  0x92   : > { %v705_v26 = vmul.f32 %v1484_v37, %v1868_v14  ;;  %v1486_v32 = vpop.eup %1485  ;;  %v950_v49 = vrot.slane %v219_v35, 7  ;;  %v737_v18 = vrot.slane %v727_v17, %v1863_v11  ;;  %v951_v14 = vrot.slane %v220_v8, 7 }
  0x93   : > { %v1488_v33 = vpop.eup %1487  ;;  %1366 = vst.msk [vmem:[%s1844_s26 + $0x42] ss:$8 sm:$0xf] %vm1840_vm0, %v670_v41  ;;  %v706_v34 = vmul.f32 %v1486_v32, %v1870_v15  ;;  %v952_v50 = vrot.slane %v221_v13, 7  ;;  %v819_v39 = vrot.slane %v809_v31, %v1863_v11  ;;  %v953_v54 = vrot.slane %v222_v42, 7 }
  0x94   : > { %v1490_v51 = vpop.eup %1489  ;;  %v707_v53 = vmul.f32 %v1488_v33, %v1875_v19  ;;  %v954_v55 = vrot.slane %v223_v43, 7  ;;  %vm2136_vm1 = vcmp.gt.f32.partialorder %v216_v23, %v947_v45  ;;  %vm2141_vm2 = vcmp.gt.f32.partialorder %v217_v7, %v948_v46 }
  0x95   : > { %v1492_v56 = vpop.eup %1491  ;;  %v708_v60 = vmul.f32 %v1490_v51, %v1877_v20  ;;  %v728_v61 = vcombine.low %v705_v26, %v706_v34  ;;  %v810_v63 = vcombine.high %v705_v26, %v706_v34  ;;  %vm2145_vm3 = vcmp.gt.f32.partialorder %v218_v10, %v949_v47 }
  0x96   : > { %v1494_v15 = vpop.eup %1493  ;;  %v709_v1 = vmul.f32 %v1492_v56, %v1879_v21  ;;  %vm2149_vm4 = vcmp.gt.f32.partialorder %v219_v35, %v950_v49  ;;  %vm2155_vm5 = vcmp.gt.f32.partialorder %v220_v8, %v951_v14  ;;  %vm2159_vm6 = vcmp.gt.f32.partialorder %v221_v13, %v952_v50 }
  0x97   : > { %v1496_v20 = vpop.eup %1495  ;;  %v710_v6 = vmul.f32 %v1494_v15, %v1890_v27  ;;  %v729_v22 = vcombine.low %v707_v53, %v708_v60  ;;  %v744_v16 = vrot.slane %v728_v61, %v1863_v11  ;;  %v811_v17 = vcombine.high %v707_v53, %v708_v60 }
  0x98   : > { %v1498_v29 = vpop.eup %1497  ;;  %v711_v31 = vmul.f32 %v1496_v20, %v1920_v48  ;;  %v826_v7 = vrot.slane %v810_v63, %v1863_v11  ;;  %vm2165_vm7 = vcmp.gt.f32.partialorder %v222_v42, %v953_v54  ;;  %v2172_v27 = vsel %vm2136_vm1, 1.0, %v1654_v4 }
  0x99   : > { %v1500_v35 = vpop.eup %1499  ;;  %v730_v37 = vcombine.low %v709_v1, %v710_v6  ;;  %v751_v8 = vrot.slane %v729_v22, %v1863_v11  ;;  %v759_v13 = vcombine.high %v737_v18, %v744_v16  ;;  %v712_v41 = vmul.f32 %v1498_v29, %v1925_v52 }
  0x9a   : > { %vm2176_vm8 = vcmp.gt.f32.partialorder %v223_v43, %v954_v55  ;;  %v1502_v42 = vpop.eup %1501  ;;  %v713_v45 = vmul.f32 %v1500_v35, %v1932_v58  ;;  %v812_v32 = vcombine.high %v709_v1, %v710_v6  ;;  %v833_v46 = vrot.slane %v811_v17, %v1863_v11 }
  0x9b   : > { %v841_v47 = vcombine.low %v819_v39, %v826_v7  ;;  %v758_v49 = vrot.slane %v730_v37, %v1863_v11  ;;  %v767_v33 = vrot.slane %v759_v13, %v1863_v11  ;;  %v714_v34 = vmul.f32 %v1502_v42, %v1934_v59 }
  0x9c   : > { %v776_v18 = vcombine.low %v711_v31, %v712_v41  ;;  %v840_v14 = vrot.slane %v812_v32, %v1863_v11  ;;  %v858_v50 = vcombine.high %v711_v31, %v712_v41  ;;  %v890_v51 = vcombine.high %v819_v39, %v826_v7 }
  0x9d   : > { %v849_v43 = vrot.slane %v841_v47, %v1863_v11  ;;  %v760_v53 = vcombine.high %v751_v8, %v758_v49  ;;  %v777_v54 = vcombine.low %v713_v45, %v714_v34  ;;  %v859_v56 = vcombine.high %v713_v45, %v714_v34 }
  0x9e   : > { %v784_v55 = vrot.slane %v776_v18, %v1863_v11  ;;  %v842_v60 = vcombine.low %v833_v46, %v840_v14  ;;  %v866_v61 = vrot.slane %v858_v50, %v1863_v11  ;;  %v891_v63 = vcombine.high %v833_v46, %v840_v14 }
  0x9f   : > { %v898_v0 = vrot.slane %v890_v51, %v1863_v11  ;;  %v774_v15 = vrot.slane %v760_v53, %v1863_v11  ;;  %v791_v1 = vrot.slane %v777_v54, %v1863_v11  ;;  %v873_v20 = vrot.slane %v859_v56, %v1863_v11 }
  0xa0   : > { %v2196_v39 = vsel %vm2141_vm2, 1.0, %v1654_v4  ;;  %v856_v6 = vrot.slane %v842_v60, %v1863_v11  ;;  %v905_v22 = vrot.slane %v891_v63, %v1863_v11  ;;  %v2203_v16 = vsel %vm2145_vm3, 1.0, %v1654_v4 }
  0xa1   : > { %v2208_v17 = vsel %vm2149_vm4, 1.0, %v1654_v4  ;;  %v775_v29 = vcombine.high %v767_v33, %v774_v15  ;;  %v792_v2 = vcombine.high %v784_v55, %v791_v1  ;;  %v874_v31 = vcombine.low %v866_v61, %v873_v20 }
  0xa2   : > { %v907_v7 = vcombine.high %v866_v61, %v873_v20  ;;  %v857_v35 = vcombine.low %v849_v43, %v856_v6  ;;  %v906_v37 = vcombine.low %v898_v0, %v905_v22  ;;  %v2213_v19 = vsel %vm2155_vm5, 1.0, %v1654_v4 }
  0xa3   : > { %v2218_v5 = vsel %vm2159_vm6, 1.0, %v1654_v4  ;;  %1367 = vst [vmem:[%s1844_s26 + $0x3] ss:$8 sm:$0xf] %v775_v29  ;;  %v799_v8 = vrot.slane %v792_v2, %v1863_v11  ;;  %v881_v13 = vrot.slane %v874_v31, %v1863_v11  ;;  %v2228_v21 = vsel %vm2165_vm7, 1.0, %v1654_v4 }
  0xa4   : > { %1368 = vst [vmem:[%s1844_s26 + $0x3] ss:$8 sm:$0xf0] %v775_v29  ;;  %v914_v41 = vrot.slane %v907_v7, %v1863_v11  ;;  %1370 = vst [vmem:[%s1844_s26 + $0x4] ss:$8 sm:$0xf] %v857_v35  ;;  %v2241_v32 = vadd.f32 %v1920_v48, %v1930_v57  ;;  %v2257_v57 = vadd.f32 %v1925_v52, %v1938_v62 }
  0xa5   : > { %1371 = vst [vmem:[%s1844_s26 + $0x4] ss:$8 sm:$0xf0] %v857_v35  ;;  %1373 = vst [vmem:[%s1844_s26 + $0x5] ss:$8 sm:$0xf] %v906_v37  ;;  %v800_v10 = vcombine.high %v799_v8, %v799_v8 }
  0xa6   : > { %1374 = vst [vmem:[%s1844_s26 + $0x5] ss:$8 sm:$0xf0] %v906_v37  ;;  %v990_v23 = vsel %vm2176_vm8, 1.0, %v1654_v4  ;;  %v1376_v42 = vadd.f32 -0.78539, %v2088_v30 }
  0xa7   : > { %v1377_v45 = vadd.f32 -0.78539, %v2093_v24  ;;  %1372 = vst.msk [vmem:[%s1844_s26 + $0x44] ss:$8 sm:$0xf] %vm1840_vm0, %v881_v13 }
  0xa8   : > { %1375 = vst.msk [vmem:[%s1844_s26 + $0x45] ss:$8 sm:$0xf] %vm1840_vm0, %v914_v41  ;;  %v1378_v46 = vadd.f32 -0.78539, %v2097_v28 }
  0xa9   : > { %v1379_v26 = vadd.f32 -0.78539, %v2105_v36  ;;  %v1380_v47 = vadd.f32 -0.78539, %v2111_v25  ;;  %v1381_v30 = vadd.f32 -0.78539, %v2115_v38  ;;  %v2264_v36 = vadd.f32 %v1932_v58, %v1946_v9 }
  0xaa   : > { %v1382_v24 = vadd.f32 -0.78539, %v2119_v40  ;;  %v1383_v48 = vadd.f32 -0.78539, %v2126_v44  ;;  %v1007_v49 = vmul.f32 0.31830987, %v1376_v42 }
  0xab   : > { %1369 = vst.msk [vmem:[%s1844_s26 + $0x43] ss:$8 sm:$0xf] %vm1840_vm0, %v800_v10  ;;  %v1008_v33 = vmul.f32 0.31830987, %v1377_v45 }
  0xac   : > { %v1009_v28 = vmul.f32 0.31830987, %v1378_v46  ;;  %v1010_v25 = vmul.f32 0.31830987, %v1379_v26  ;;  %v1011_v38 = vmul.f32 0.31830987, %v1380_v47  ;;  %v1031_v44 = vfloor.f32 %v1007_v49 }
  0xad   : > { %v1012_v34 = vmul.f32 0.31830987, %v1381_v30  ;;  %v1013_v40 = vmul.f32 0.31830987, %v1382_v24  ;;  %v1014_v18 = vmul.f32 0.31830987, %v1383_v48  ;;  %v1032_v14 = vfloor.f32 %v1008_v33 }
  0xae   : > { %v1033_v43 = vfloor.f32 %v1009_v28  ;;  %v1034_v52 = vfloor.f32 %v1010_v25  ;;  %v1035_v62 = vfloor.f32 %v1011_v38  ;;  %v1043_v54 = vmul.f32 3.1415927, %v1031_v44  ;;  %v227_v44 = vld [vmem:[%s1829_s4 + $0xb8] sm:$0xff] }
  0xaf   : > { %v1036_v50 = vfloor.f32 %v1012_v34  ;;  %v1037_v51 = vfloor.f32 %v1013_v40  ;;  %v1038_v53 = vfloor.f32 %v1014_v18  ;;  %v1044_v55 = vmul.f32 3.1415927, %v1032_v14  ;;  %v224_v34 = vld [vmem:[%s1829_s4 + $0xa0] sm:$0xff] }
  0xb0   : > { %v1045_v56 = vmul.f32 3.1415927, %v1033_v43  ;;  %v1046_v60 = vmul.f32 3.1415927, %v1034_v52  ;;  %v1047_v61 = vmul.f32 3.1415927, %v1035_v62  ;;  %v1055_v0 = vsub.f32 %v1376_v42, %v1043_v54 }
  0xb1   : > { %v1048_v58 = vmul.f32 3.1415927, %v1036_v50  ;;  %v1049_v9 = vmul.f32 3.1415927, %v1037_v51  ;;  %v1050_v63 = vmul.f32 3.1415927, %v1038_v53  ;;  %v1056_v15 = vsub.f32 %v1377_v45, %v1044_v55 }
  0xb2   : > { %v1057_v1 = vsub.f32 %v1378_v46, %v1045_v56  ;;  %v1058_v20 = vsub.f32 %v1379_v26, %v1046_v60  ;;  %v1059_v6 = vsub.f32 %v1380_v47, %v1047_v61  ;;  %v1067_v31 = vadd.f32 0.78539, %v1055_v0 }
  0xb3   : > { %v1060_v22 = vsub.f32 %v1381_v30, %v1048_v58  ;;  %v1061_v29 = vsub.f32 %v1382_v24, %v1049_v9  ;;  %v1062_v2 = vsub.f32 %v1383_v48, %v1050_v63  ;;  %v1068_v7 = vadd.f32 0.78539, %v1056_v15 }
  0xb4   : > { %v1069_v35 = vadd.f32 0.78539, %v1057_v1  ;;  %v1070_v37 = vadd.f32 0.78539, %v1058_v20  ;;  %v1071_v8 = vadd.f32 0.78539, %v1059_v6  ;;  %v934_v24 = vadd.f32 %v1934_v59, %v1949_v12 }
  0xb5   : > { %v1072_v13 = vadd.f32 0.78539, %v1060_v22  ;;  %v1073_v41 = vadd.f32 0.78539, %v1061_v29  ;;  %v1074_v10 = vadd.f32 0.78539, %v1062_v2 }
  0xb6   : > { %v1079_v49 = vmul.f32 3.1415927, %v2172_v27  ;;  %v1080_v33 = vmul.f32 3.1415927, %v2196_v39  ;;  %v1081_v42 = vmul.f32 3.1415927, %v2203_v16 }
  0xb7   : > { %v1082_v45 = vmul.f32 3.1415927, %v2208_v17  ;;  %v1083_v46 = vmul.f32 3.1415927, %v2213_v19  ;;  %v1084_v26 = vmul.f32 3.1415927, %v2218_v5 }
  0xb8   : > { %v1085_v47 = vmul.f32 3.1415927, %v2228_v21  ;;  %v1086_v30 = vmul.f32 3.1415927, %v990_v23  ;;  %v1103_v27 = vrot.slane %v1079_v49, 3  ;;  %v1104_v39 = vrot.slane %v1080_v33, 3 }
  0xb9   : > { %v1105_v48 = vrot.slane %v1081_v42, 3  ;;  %v1106_v28 = vrot.slane %v1082_v45, 3  ;;  %v1107_v16 = vrot.slane %v1083_v46, 3  ;;  %v1108_v25 = vrot.slane %v1084_v26, 3  ;;  %v225_v19 = vld [vmem:[%s1829_s4 + $0xa8] sm:$0xff]  ;;  %v226_v23 = vld [vmem:[%s1829_s4 + $0xb0] sm:$0xff] }
  0xba   : > { %v1109_v38 = vrot.slane %v1085_v47, 3  ;;  %v1110_v17 = vrot.slane %v1086_v30, 3  ;;  %v1127_v40 = vadd.f32 %v1103_v27, %v1067_v31  ;;  %v1128_v5 = vadd.f32 %v1104_v39, %v1068_v7 }
  0xbb   : > { %v1129_v18 = vadd.f32 %v1105_v48, %v1069_v35  ;;  %v1130_v21 = vadd.f32 %v1106_v28, %v1070_v37  ;;  %v1131_v14 = vadd.f32 %v1107_v16, %v1071_v8  ;;  %v1132_v43 = vadd.f32 %v1108_v25, %v1072_v13 }
  0xbc   : > { %v1133_v59 = vadd.f32 %v1109_v38, %v1073_v41  ;;  %v1134_v12 = vadd.f32 %v1110_v17, %v1074_v10  ;;  %v1151_v52 = vcombine.high %v1127_v40, %v1128_v5  ;;  %v955_v50 = vrot.slane %v224_v34, 7 }
  0xbd   : > { %v1152_v62 = vcombine.high %v1129_v18, %v1130_v21  ;;  %v956_v51 = vrot.slane %v225_v19, 7  ;;  %v1153_v53 = vcombine.high %v1131_v14, %v1132_v43  ;;  %v957_v55 = vrot.slane %v226_v23, 7 }
  0xbe   : > { %v1154_v54 = vcombine.high %v1133_v59, %v1134_v12  ;;  %v958_v56 = vrot.slane %v227_v44, 7  ;;  %v1161_v60 = vrot.slane %v1151_v52, %v1863_v11  ;;  %vm979_vm9 = vcmp.gt.f32.partialorder %v224_v34, %v955_v50 }
  0xbf   : > { %v1168_v61 = vrot.slane %v1152_v62, %v1863_v11  ;;  %vm980_vm10 = vcmp.gt.f32.partialorder %v225_v19, %v956_v51  ;;  %v1175_v58 = vrot.slane %v1153_v53, %v1863_v11  ;;  %vm981_vm11 = vcmp.gt.f32.partialorder %v226_v23, %v957_v55 }
  0xc0   : > { %v1182_v9 = vrot.slane %v1154_v54, %v1863_v11  ;;  %vm982_vm12 = vcmp.gt.f32.partialorder %v227_v44, %v958_v56  ;;  %v991_v0 = vsel %vm979_vm9, 1.0, %v1654_v4  ;;  %v992_v1 = vsel %vm980_vm10, 1.0, %v1654_v4 }
  0xc1   : > { %v1183_v63 = vcombine.low %v1161_v60, %v1168_v61  ;;  %v1384_v20 = vadd.f32 -0.78539, %v2241_v32  ;;  %v1385_v6 = vadd.f32 -0.78539, %v2257_v57  ;;  %v993_v29 = vsel %vm981_vm11, 1.0, %v1654_v4 }
  0xc2   : > { %v1184_v15 = vcombine.low %v1175_v58, %v1182_v9  ;;  %v1386_v2 = vadd.f32 -0.78539, %v2264_v36  ;;  %v1387_v31 = vadd.f32 -0.78539, %v934_v24  ;;  %v994_v35 = vsel %vm982_vm12, 1.0, %v1654_v4 }
  0xc3   : > { %v1191_v22 = vrot.slane %v1183_v63, %v1863_v11  ;;  %v1015_v37 = vmul.f32 0.31830987, %v1384_v20  ;;  %v1016_v8 = vmul.f32 0.31830987, %v1385_v6  ;;  %v1087_v32 = vmul.f32 3.1415927, %v991_v0 }
  0xc4   : > { %v1198_v7 = vrot.slane %v1184_v15, %v1863_v11  ;;  %v1017_v13 = vmul.f32 0.31830987, %v1386_v2  ;;  %v1018_v41 = vmul.f32 0.31830987, %v1387_v31  ;;  %v1088_v33 = vmul.f32 3.1415927, %v992_v1 }
  0xc5   : > { %v1039_v57 = vfloor.f32 %v1015_v37  ;;  %v1040_v49 = vfloor.f32 %v1016_v8  ;;  %v1089_v46 = vmul.f32 3.1415927, %v993_v29  ;;  %v1090_v36 = vmul.f32 3.1415927, %v994_v35 }
  0xc6   : > { %v1199_v10 = vcombine.high %v1191_v22, %v1198_v7  ;;  %v1041_v42 = vfloor.f32 %v1017_v13  ;;  %v1042_v45 = vfloor.f32 %v1018_v41  ;;  %v1111_v39 = vrot.slane %v1087_v32, 3 }
  0xc7   : > { %v1051_v26 = vmul.f32 3.1415927, %v1039_v57  ;;  %v1052_v47 = vmul.f32 3.1415927, %v1040_v49  ;;  %v1112_v48 = vrot.slane %v1088_v33, 3  ;;  %v1113_v25 = vrot.slane %v1089_v46, 3 }
  0xc8   : > { %1388 = vst [vmem:[%s1844_s26 + $0x6] ss:$8 sm:$0xf] %v1199_v10  ;;  %1389 = vst [vmem:[%s1844_s26 + $0x6] ss:$8 sm:$0xf0] %v1199_v10 }
  0xc9   : > { %v1053_v30 = vmul.f32 3.1415927, %v1041_v42  ;;  %v1054_v24 = vmul.f32 3.1415927, %v1042_v45  ;;  %v1063_v4 = vsub.f32 %v1384_v20, %v1051_v26  ;;  %v1064_v27 = vsub.f32 %v1385_v6, %v1052_v47 }
  0xca   : > { %v1114_v38 = vrot.slane %v1090_v36, 3 }
  0xcb   : > { %v1065_v28 = vsub.f32 %v1386_v2, %v1053_v30  ;;  %v1066_v16 = vsub.f32 %v1387_v31, %v1054_v24  ;;  %v1075_v17 = vadd.f32 0.78539, %v1063_v4  ;;  %v1076_v34 = vadd.f32 0.78539, %v1064_v27 }
  0xcd   : > { %v1077_v19 = vadd.f32 0.78539, %v1065_v28  ;;  %v1078_v40 = vadd.f32 0.78539, %v1066_v16  ;;  %v1135_v5 = vadd.f32 %v1111_v39, %v1075_v17  ;;  %v1136_v18 = vadd.f32 %v1112_v48, %v1076_v34 }
  0xcf   : > { %v1137_v21 = vadd.f32 %v1113_v25, %v1077_v19  ;;  %v1138_v23 = vadd.f32 %v1114_v38, %v1078_v40  ;;  %v1200_v44 = vcombine.high %v1135_v5, %v1136_v18 }
  0xd1   : > { %v1201_v14 = vcombine.high %v1137_v21, %v1138_v23  ;;  %v1208_v43 = vrot.slane %v1200_v44, %v1863_v11 }
  0xd3   : > { %v1215_v59 = vrot.slane %v1201_v14, %v1863_v11 }
  0xd5   : > { %v1216_v12 = vcombine.low %v1208_v43, %v1215_v59 }
  0xd7   : > { %v1223_v52 = vrot.slane %v1216_v12, %v1863_v11 }
  0xd9   : > { %v1224_v62 = vcombine.high %v1223_v52, %v1223_v52 }
  0xdb   : > { %1390 = vst.msk [vmem:[%s1844_s26 + $0x46] ss:$8 sm:$0xf] %vm1840_vm0, %v1224_v62 }
  0xdc   : > { %1574 = shalt.err (!%p1571_p7)
}
  0xdd   : > { %s1575_s6 = scalar_lea.hbm %s2302_s29, 1536  ;;  %s1579_s19 = scalar_lea.hbm %s2356_s2, 3072 }
  0xde   : > { %p1576_p13 = scmp.ne.s32.totalorder %s2302_s29, %s1575_s6  ;;  %p1580_p12 = scmp.lt.u32.totalorder %s2302_s29, %s2356_s2 }
  0xdf   : > { %p1581_p4 = scmp.lt.u32.totalorder %s1579_s19, %s1575_s6  ;;  %p1583_p5 = scmp.lt.u32.totalorder %s1575_s6, %s2302_s29 }
  0xe0   : > { %p1577_p2 = pnand %p1576_p13, %p2395_p10 }
  0xe1   : > { %p1582_p8 = por %p1581_p4, %p1580_p12 }
  0xe2   : > { %p1578_p6 = pneg %p1577_p2 }
  0xe3   : > { %p1584_p11 = por %p1583_p5, %p1582_p8 }
  0xe5   : > { %p1585_p1 = pnand %p1584_p11, %p1578_p6 }
  0xe7   : > { %1588 = shalt.err (!%p1585_p1)
}
  0xe8   : > { %1408 = dma.vmem_to_hbm [thread:$0]  (%p2395_p10), %s2304_s20, 1536, %s2302_s29, %s1240_s5  }
  0xe9 PF: > { %s1268_s4 = sand.u32 1, %s1627_s9   ;;  %p2396_p0 = scmp.ne.s32.totalorder %s2367_s22, 0 }
  0xea   : > { %p2397_p9 = scmp.ge.s32.totalorder %s1647_s14, 2  ;;  %s1269_s23 = scalar_lea.sflag [#allocation4], %s1268_s4 }
  0xec   : > { %p1419_p3 = pnand %p2397_p9, %p2396_p0 }
  0xee   : > { %1622 = dma.done.wait (!%p1419_p3), %s1269_s23, 1536  }
  0xef   : > { %1624 = vsyncadd (!%p1419_p3), %s1269_s23, 4294965760  ;;  %s19_s14 = sadd.s32 1, %s1647_s14   ;;  %s2398_s9 = smov %s1631_s10 }
  0xf0   : > { %p16_p7 = scmp.ge.s32.totalorder %s19_s14, 4   ;;  %s2399_s10 = smov %s1635_s11 }
  0xf1   : > { %s2400_s11 = smov %s1790_s25  ;;  %s2401_s12 = smov %s1643_s13 }
  0xf2   : > { %s2402_s13 = smov %s2404_s28  ;;  %18 = sbr.rel (!%p16_p7) target bundleno = 7 (0x7), region = 93 }
  0xf9   :  { %1274 = vsyncpa [#allocation3], 1 }
  0xfa   :  { %1276 = vsyncpa [#allocation3 + $0x1], 1 }
  0xfb   :  { %1277 = vsyncpa [#allocation6], 1 }
  0xfc   :  { %1278 = vsyncpa [#allocation4], 1 }
  0xfd   :  { %1280 = vsyncpa [#allocation4 + $0x1], 1 }

</bundles_post_ra>
